<compile_context>
chip_gen: v7x
topology: tpu7x:2x2x1
jax: 0.10.0
libtpu: 0.0.40
codegen_flags: <defaults>
</compile_context>

<pallas_src>
import functools

import jax
import jax.numpy as jnp
from jax.experimental import pallas as pl
from jax.experimental.pallas import tpu as pltpu


def _round_up(n: int, m: int) -> int:
    return ((n + m - 1) // m) * m


def _cdiv(a: int, b: int) -> int:
    return (a + b - 1) // b


# ---------------------------------------------------------------------------
# Kernel
# ---------------------------------------------------------------------------
def _mlp_kernel(x_ref, w1_ref, b1_ref, w2_ref, b2_ref, out_ref):
    """Fused fc1 -> ReLU -> fc2 on one batch tile (weights stay VMEM-resident)."""
    # x arrives as f32 straight from HBM; cast to bf16 for the MXU in-kernel.
    x = x_ref[...].astype(jnp.bfloat16)                       # [TB, D_in]
    # fc1: bf16 MXU inputs, f32 accumulate.
    h = jnp.dot(x, w1_ref[...], preferred_element_type=jnp.float32)
    # Bias add + ReLU in f32 on the VPU (v5e-safe: no bf16 VPU there).
    h = jnp.maximum(h + b1_ref[...], 0.0)                     # [TB, Hp] f32
    # fc2: deliberate bf16 downcast of the activation for the MXU, f32 acc.
    y = jnp.dot(h.astype(jnp.bfloat16), w2_ref[...],
                preferred_element_type=jnp.float32)
    out_ref[...] = (y + b2_ref[...]).astype(out_ref.dtype)    # [TB, Np]


# ---------------------------------------------------------------------------
# One-time parameter packing (NOT on the per-call path)
# ---------------------------------------------------------------------------
def pack_frase_params(w1, b1, w2, b2):
    """Pad hidden/output dims to 128 lanes and cast weights to bf16, once."""
    D_in, H = w1.shape
    N = w2.shape[1]
    Hp = _round_up(H, 128)
    Np = _round_up(N, 128)
    w1p = jnp.zeros((D_in, Hp), jnp.bfloat16).at[:, :H].set(w1.astype(jnp.bfloat16))
    b1p = jnp.zeros((1, Hp), jnp.float32).at[:, :H].set(
        jnp.reshape(b1, (1, H)).astype(jnp.float32))
    w2p = jnp.zeros((Hp, Np), jnp.bfloat16).at[:H, :N].set(w2.astype(jnp.bfloat16))
    b2p = jnp.zeros((1, Np), jnp.float32).at[:, :N].set(
        jnp.reshape(b2, (1, N)).astype(jnp.float32))
    return {"w1": w1p, "b1": b1p, "w2": w2p, "b2": b2p, "output_dim": int(N)}


# ---------------------------------------------------------------------------
# Forward
# ---------------------------------------------------------------------------
@functools.partial(
    jax.jit,
    static_argnames=("output_dim", "batch_tile", "out_dtype",
                     "single_buffer_weights"),
)
def _forward_impl(x, w1p, b1p, w2p, b2p, *, output_dim, batch_tile, out_dtype,
                  single_buffer_weights):
    B, D_in = x.shape
    Hp = w1p.shape[1]
    Np = w2p.shape[1]

    resident_weight_bytes = (D_in * Hp + Hp * Np) * 2 + (Hp + Np) * 4
    if resident_weight_bytes > 48 * 1024 * 1024:
        # TODO(synk): for very large hidden/output dims, tile Hp (the fc2
        # contraction) with an extra "arbitrary" grid axis + f32 accumulator
        # scratch instead of keeping both weight matrices VMEM-resident.
        raise ValueError("Weights too large for the VMEM-resident fast path.")

    # Batch tile: fill the 256-wide v6e/v7x MXU, stay a multiple of 16 (bf16
    # sublane packing; covers f32's 8), and keep >= 2 grid steps when the
    # batch allows so the "parallel" axis shards across v7x's 2 TensorCores.
    TB = min(int(batch_tile), B)
    TB = _round_up(TB, 16) if B >= 16 else _round_up(max(TB, 1), 8)
    if B > 32:
        TB = min(TB, _round_up(_cdiv(B, 2), 16))
    grid_b = _cdiv(B, TB)

    out_itemsize = jnp.dtype(out_dtype).itemsize
    wbuf = 1 if single_buffer_weights else 2
    vmem_est = (
        wbuf * resident_weight_bytes
        + 2 * TB * D_in * 4             # double-buffered x tiles (f32)
        + 2 * TB * Np * out_itemsize    # double-buffered out tiles
        + TB * Hp * (4 + 2)             # h in f32 + bf16 copy
        + TB * Np * 4                   # fc2 f32 accumulator
    )
    vmem_limit = int(min(max(2 * vmem_est, 32 * 1024 * 1024),
                         60 * 1024 * 1024))

    weight_kwargs = (
        {"pipeline_mode": pl.Buffered(1)} if single_buffer_weights else {}
    )

    flops = 2 * B * (D_in * Hp + Hp * Np)
    bytes_accessed = B * D_in * 4 + resident_weight_bytes + B * Np * out_itemsize

    out = pl.pallas_call(
        _mlp_kernel,
        out_shape=jax.ShapeDtypeStruct((B, Np), out_dtype),
        grid=(grid_b,),
        in_specs=[
            # Batch-tiled activation (f32 straight from HBM).
            pl.BlockSpec((TB, D_in), lambda i: (i, 0)),
            # Weights / biases: constant index_map -> DMA'd once, VMEM-resident
            # (single-buffered: double-buffering a constant block is waste).
            pl.BlockSpec((D_in, Hp), lambda i: (0, 0), **weight_kwargs),
            pl.BlockSpec((1, Hp), lambda i: (0, 0), **weight_kwargs),
            pl.BlockSpec((Hp, Np), lambda i: (0, 0), **weight_kwargs),
            pl.BlockSpec((1, Np), lambda i: (0, 0), **weight_kwargs),
        ],
        out_specs=pl.BlockSpec((TB, Np), lambda i: (i, 0)),
        compiler_params=pltpu.CompilerParams(
            dimension_semantics=("parallel",),
            vmem_limit_bytes=vmem_limit,
        ),
        cost_estimate=pl.CostEstimate(
            flops=flops, transcendentals=0, bytes_accessed=bytes_accessed),
    )(x, w1p, b1p, w2p, b2p)

    # Lane-padded output -> slice back to the true output_dim.
    return out[:, :output_dim]


_WEIGHT_SINGLE_BUFFER_OK = None  # one-time probe result for pl.Buffered(1)


def frase_classifier_forward(x, params, *, batch_tile=256,
                             out_dtype=jnp.float32):
    """Fused FraseClassifier forward: relu(x @ w1 + b1) @ w2 + b2.

    `params` must come from pack_frase_params (pre-padded, bf16 weights).
    """
    global _WEIGHT_SINGLE_BUFFER_OK
    args = (x, params["w1"], params["b1"], params["w2"], params["b2"])
    kwargs = dict(output_dim=params["output_dim"], batch_tile=int(batch_tile),
                  out_dtype=out_dtype)
    if _WEIGHT_SINGLE_BUFFER_OK is None:
        try:
            out = _forward_impl(*args, single_buffer_weights=True, **kwargs)
            _WEIGHT_SINGLE_BUFFER_OK = True
            return out
        except Exception:
            # pipeline_mode=pl.Buffered(1) not supported on this JAX build ->
            # fall back to default (double) buffering for the constant blocks.
            _WEIGHT_SINGLE_BUFFER_OK = False
    return _forward_impl(*args, single_buffer_weights=_WEIGHT_SINGLE_BUFFER_OK,
                         **kwargs)


# ---------------------------------------------------------------------------
# References
# ---------------------------------------------------------------------------
def reference_forward_f32(x, w1, b1, w2, b2):
    """Plain-JAX f32 reference matching the PyTorch module semantics."""
    h = jnp.maximum(x @ w1 + jnp.reshape(b1, (1, -1)), 0.0)
    return h @ w2 + jnp.reshape(b2, (1, -1))


def reference_forward_bf16(x, w1, b1, w2, b2):
    """Reference with the same bf16-input / f32-accumulate casting policy."""
    h = jnp.dot(x.astype(jnp.bfloat16), w1.astype(jnp.bfloat16),
                preferred_element_type=jnp.float32) + jnp.reshape(b1, (1, -1))
    h = jnp.maximum(h, 0.0)
    return jnp.dot(h.astype(jnp.bfloat16), w2.astype(jnp.bfloat16),
                   preferred_element_type=jnp.float32) + jnp.reshape(b2, (1, -1))


if __name__ == "__main__":
    # Small shapes consistent with the module's forward.  With the default
    # batch_tile the wrapper picks TB=32 -> grid=(2,), so batch pipelining
    # (and v7x 2-TC sharding) is actually exercised.
    batch, input_dim, hidden_dim, output_dim = 64, 32, 64, 16

    key = jax.random.PRNGKey(0)
    kx, k1, kb1, k2, kb2 = jax.random.split(key, 5)

    x = jax.random.normal(kx, (batch, input_dim), dtype=jnp.float32)
    # fc1.weight is [hidden, input] in torch -> stored transposed here so the
    # kernel computes x @ W + b (identical to nn.Linear with W = W_pt.T).
    w1 = jax.random.normal(k1, (input_dim, hidden_dim), dtype=jnp.float32) * 0.1
    b1 = jax.random.normal(kb1, (hidden_dim,), dtype=jnp.float32) * 0.1
    w2 = jax.random.normal(k2, (hidden_dim, output_dim), dtype=jnp.float32) * 0.1
    b2 = jax.random.normal(kb2, (output_dim,), dtype=jnp.float32) * 0.1

    # One-time parameter packing (pad to 128 lanes, cast to bf16) -- this is
    # model-init work, NOT part of the per-call forward path.
    params = pack_frase_params(w1, b1, w2, b2)
    params = jax.block_until_ready(params)

    out = frase_classifier_forward(x, params)
    out = jax.block_until_ready(out)
    assert out.shape == (batch, output_dim), out.shape
    assert out.dtype == jnp.float32

    # Tight check vs a reference using the same bf16-input / f32-acc policy.
    ref_bf16 = reference_forward_bf16(x, w1, b1, w2, b2)
    assert jnp.allclose(out, ref_bf16, atol=2e-3, rtol=2e-3), \
        "mismatch vs bf16-policy reference"

    # Loose check vs the pure-f32 PyTorch-semantics reference (difference is
    # only bf16 input quantization, documented).
    ref_f32 = reference_forward_f32(x, w1, b1, w2, b2)
    assert jnp.allclose(out, ref_f32, atol=5e-2, rtol=5e-2), \
        "mismatch vs f32 reference"

    print("KERNEL_OK")
</pallas_src>

<mosaic_0001>
module attributes {stable_mosaic.version = 11 : i64} {
  func.func @_mlp_kernel(%arg0: i32, %arg1: memref<32x32xf32, #tpu.memory_space<vmem>>, %arg2: memref<32x128xbf16, #tpu.memory_space<vmem>>, %arg3: memref<1x128xf32, #tpu.memory_space<vmem>>, %arg4: memref<128x128xbf16, #tpu.memory_space<vmem>>, %arg5: memref<1x128xf32, #tpu.memory_space<vmem>>, %arg6: memref<32x128xf32, #tpu.memory_space<vmem>>) attributes {dimension_semantics = [#tpu.dimension_semantics<parallel>], iteration_bounds = array<i64: 2>, scalar_prefetch = 0 : i64, scratch_operands = 0 : i64, tpu.core_type = #tpu.core_type<tc>, window_params = [{transform_indices = @transform_0, window_bounds = array<i64: 32, 32>}, {pipeline_mode = #tpu.pipeline_mode<synchronous>, transform_indices = @transform_1, window_bounds = array<i64: 32, 128>}, {pipeline_mode = #tpu.pipeline_mode<synchronous>, transform_indices = @transform_2, window_bounds = array<i64: 1, 128>}, {pipeline_mode = #tpu.pipeline_mode<synchronous>, transform_indices = @transform_3, window_bounds = array<i64: 128, 128>}, {pipeline_mode = #tpu.pipeline_mode<synchronous>, transform_indices = @transform_4, window_bounds = array<i64: 1, 128>}, {transform_indices = @transform_5, window_bounds = array<i64: 32, 128>}]} {
    %c0 = arith.constant 0 : index
    %c0_0 = arith.constant 0 : index
    %0 = vector.load %arg1[%c0, %c0_0] : memref<32x32xf32, #tpu.memory_space<vmem>>, vector<32x32xf32>
    %1 = arith.truncf %0 : vector<32x32xf32> to vector<32x32xbf16>
    %c0_1 = arith.constant 0 : index
    %c0_2 = arith.constant 0 : index
    %2 = vector.load %arg2[%c0_1, %c0_2] : memref<32x128xbf16, #tpu.memory_space<vmem>>, vector<32x128xbf16>
    %cst = arith.constant dense<0.000000e+00> : vector<32x128xf32>
    %3 = tpu.matmul %1, %2, %cst {dimension_numbers = #tpu.dot_dimension_numbers<[1], [0], [0], [1], [0, 0, 1, 1], [], []>} : vector<32x32xbf16>, vector<32x128xbf16>, vector<32x128xf32> -> vector<32x128xf32>
    %c0_3 = arith.constant 0 : index
    %c0_4 = arith.constant 0 : index
    %4 = vector.load %arg3[%c0_3, %c0_4] : memref<1x128xf32, #tpu.memory_space<vmem>>, vector<1x128xf32>
    %5 = vector.broadcast %4 : vector<1x128xf32> to vector<32x128xf32>
    %6 = arith.addf %3, %5 : vector<32x128xf32>
    %cst_5 = arith.constant 0.000000e+00 : f32
    %7 = vector.broadcast %cst_5 : f32 to vector<32x128xf32>
    %8 = arith.maximumf %6, %7 : vector<32x128xf32>
    %9 = arith.truncf %8 : vector<32x128xf32> to vector<32x128xbf16>
    %c0_6 = arith.constant 0 : index
    %c0_7 = arith.constant 0 : index
    %10 = vector.load %arg4[%c0_6, %c0_7] : memref<128x128xbf16, #tpu.memory_space<vmem>>, vector<128x128xbf16>
    %cst_8 = arith.constant dense<0.000000e+00> : vector<32x128xf32>
    %11 = tpu.matmul %9, %10, %cst_8 {dimension_numbers = #tpu.dot_dimension_numbers<[1], [0], [0], [1], [0, 0, 1, 1], [], []>} : vector<32x128xbf16>, vector<128x128xbf16>, vector<32x128xf32> -> vector<32x128xf32>
    %c0_9 = arith.constant 0 : index
    %c0_10 = arith.constant 0 : index
    %12 = vector.load %arg5[%c0_9, %c0_10] : memref<1x128xf32, #tpu.memory_space<vmem>>, vector<1x128xf32>
    %13 = vector.broadcast %12 : vector<1x128xf32> to vector<32x128xf32>
    %14 = arith.addf %11, %13 : vector<32x128xf32>
    %c0_11 = arith.constant 0 : index
    %c0_12 = arith.constant 0 : index
    %15 = vector.load %arg6[%c0_11, %c0_12] : memref<32x128xf32, #tpu.memory_space<vmem>>, vector<32x128xf32>
    tpu.vector_store %arg6[%c0_11, %c0_12], %14 {strides = array<i32>} : memref<32x128xf32, #tpu.memory_space<vmem>>, vector<32x128xf32>,
    return
  }
  func.func @transform_0(%arg0: i32) -> (i32, i32) {
    %c0_i32 = arith.constant 0 : i32
    %c0_i32_0 = arith.constant 0 : i32
    return %arg0, %c0_i32 : i32, i32
  }
  func.func @transform_1(%arg0: i32) -> (i32, i32) {
    %c0_i32 = arith.constant 0 : i32
    %c0_i32_0 = arith.constant 0 : i32
    %c0_i32_1 = arith.constant 0 : i32
    return %c0_i32, %c0_i32_0 : i32, i32
  }
  func.func @transform_2(%arg0: i32) -> (i32, i32) {
    %c0_i32 = arith.constant 0 : i32
    %c0_i32_0 = arith.constant 0 : i32
    %c0_i32_1 = arith.constant 0 : i32
    return %c0_i32, %c0_i32_0 : i32, i32
  }
  func.func @transform_3(%arg0: i32) -> (i32, i32) {
    %c0_i32 = arith.constant 0 : i32
    %c0_i32_0 = arith.constant 0 : i32
    %c0_i32_1 = arith.constant 0 : i32
    return %c0_i32, %c0_i32_0 : i32, i32
  }
  func.func @transform_4(%arg0: i32) -> (i32, i32) {
    %c0_i32 = arith.constant 0 : i32
    %c0_i32_0 = arith.constant 0 : i32
    %c0_i32_1 = arith.constant 0 : i32
    return %c0_i32, %c0_i32_0 : i32, i32
  }
  func.func @transform_5(%arg0: i32) -> (i32, i32) {
    %c0_i32 = arith.constant 0 : i32
    %c0_i32_0 = arith.constant 0 : i32
    return %arg0, %c0_i32 : i32, i32
  }
}

module attributes {stable_mosaic.version = 11 : i64} {
  func.func @_mlp_kernel(%arg0: i32, %arg1: memref<32x32xf32, #tpu.memory_space<vmem>>, %arg2: memref<32x128xbf16, #tpu.memory_space<vmem>>, %arg3: memref<1x128xf32, #tpu.memory_space<vmem>>, %arg4: memref<128x128xbf16, #tpu.memory_space<vmem>>, %arg5: memref<1x128xf32, #tpu.memory_space<vmem>>, %arg6: memref<32x128xf32, #tpu.memory_space<vmem>>) attributes {dimension_semantics = [#tpu.dimension_semantics<parallel>], iteration_bounds = array<i64: 2>, scalar_prefetch = 0 : i64, scratch_operands = 0 : i64, tpu.core_type = #tpu.core_type<tc>, window_params = [{transform_indices = @transform_0, window_bounds = array<i64: 32, 32>}, {pipeline_mode = #tpu.pipeline_mode<synchronous>, transform_indices = @transform_1, window_bounds = array<i64: 32, 128>}, {pipeline_mode = #tpu.pipeline_mode<synchronous>, transform_indices = @transform_2, window_bounds = array<i64: 1, 128>}, {pipeline_mode = #tpu.pipeline_mode<synchronous>, transform_indices = @transform_3, window_bounds = array<i64: 128, 128>}, {pipeline_mode = #tpu.pipeline_mode<synchronous>, transform_indices = @transform_4, window_bounds = array<i64: 1, 128>}, {transform_indices = @transform_5, window_bounds = array<i64: 32, 128>}]} {
    %c0 = arith.constant 0 : index
    %c0_0 = arith.constant 0 : index
    %0 = vector.load %arg1[%c0, %c0_0] : memref<32x32xf32, #tpu.memory_space<vmem>>, vector<32x32xf32>
    %1 = arith.truncf %0 : vector<32x32xf32> to vector<32x32xbf16>
    %c0_1 = arith.constant 0 : index
    %c0_2 = arith.constant 0 : index
    %2 = vector.load %arg2[%c0_1, %c0_2] : memref<32x128xbf16, #tpu.memory_space<vmem>>, vector<32x128xbf16>
    %cst = arith.constant dense<0.000000e+00> : vector<32x128xf32>
    %3 = tpu.matmul %1, %2, %cst {dimension_numbers = #tpu.dot_dimension_numbers<[1], [0], [0], [1], [0, 0, 1, 1], [], []>} : vector<32x32xbf16>, vector<32x128xbf16>, vector<32x128xf32> -> vector<32x128xf32>
    %c0_3 = arith.constant 0 : index
    %c0_4 = arith.constant 0 : index
    %4 = vector.load %arg3[%c0_3, %c0_4] : memref<1x128xf32, #tpu.memory_space<vmem>>, vector<1x128xf32>
    %5 = vector.broadcast %4 : vector<1x128xf32> to vector<32x128xf32>
    %6 = arith.addf %3, %5 : vector<32x128xf32>
    %cst_5 = arith.constant 0.000000e+00 : f32
    %7 = vector.broadcast %cst_5 : f32 to vector<32x128xf32>
    %8 = arith.maximumf %6, %7 : vector<32x128xf32>
    %9 = arith.truncf %8 : vector<32x128xf32> to vector<32x128xbf16>
    %c0_6 = arith.constant 0 : index
    %c0_7 = arith.constant 0 : index
    %10 = vector.load %arg4[%c0_6, %c0_7] : memref<128x128xbf16, #tpu.memory_space<vmem>>, vector<128x128xbf16>
    %cst_8 = arith.constant dense<0.000000e+00> : vector<32x128xf32>
    %11 = tpu.matmul %9, %10, %cst_8 {dimension_numbers = #tpu.dot_dimension_numbers<[1], [0], [0], [1], [0, 0, 1, 1], [], []>} : vector<32x128xbf16>, vector<128x128xbf16>, vector<32x128xf32> -> vector<32x128xf32>
    %c0_9 = arith.constant 0 : index
    %c0_10 = arith.constant 0 : index
    %12 = vector.load %arg5[%c0_9, %c0_10] : memref<1x128xf32, #tpu.memory_space<vmem>>, vector<1x128xf32>
    %13 = vector.broadcast %12 : vector<1x128xf32> to vector<32x128xf32>
    %14 = arith.addf %11, %13 : vector<32x128xf32>
    %c0_11 = arith.constant 0 : index
    %c0_12 = arith.constant 0 : index
    %15 = vector.load %arg6[%c0_11, %c0_12] : memref<32x128xf32, #tpu.memory_space<vmem>>, vector<32x128xf32>
    tpu.vector_store %arg6[%c0_11, %c0_12], %14 {strides = array<i32>} : memref<32x128xf32, #tpu.memory_space<vmem>>, vector<32x128xf32>,
    return
  }
  func.func @transform_0(%arg0: i32) -> (i32, i32) {
    %c0_i32 = arith.constant 0 : i32
    %c0_i32_0 = arith.constant 0 : i32
    return %arg0, %c0_i32 : i32, i32
  }
  func.func @transform_1(%arg0: i32) -> (i32, i32) {
    %c0_i32 = arith.constant 0 : i32
    %c0_i32_0 = arith.constant 0 : i32
    %c0_i32_1 = arith.constant 0 : i32
    return %c0_i32, %c0_i32_0 : i32, i32
  }
  func.func @transform_2(%arg0: i32) -> (i32, i32) {
    %c0_i32 = arith.constant 0 : i32
    %c0_i32_0 = arith.constant 0 : i32
    %c0_i32_1 = arith.constant 0 : i32
    return %c0_i32, %c0_i32_0 : i32, i32
  }
  func.func @transform_3(%arg0: i32) -> (i32, i32) {
    %c0_i32 = arith.constant 0 : i32
    %c0_i32_0 = arith.constant 0 : i32
    %c0_i32_1 = arith.constant 0 : i32
    return %c0_i32, %c0_i32_0 : i32, i32
  }
  func.func @transform_4(%arg0: i32) -> (i32, i32) {
    %c0_i32 = arith.constant 0 : i32
    %c0_i32_0 = arith.constant 0 : i32
    %c0_i32_1 = arith.constant 0 : i32
    return %c0_i32, %c0_i32_0 : i32, i32
  }
  func.func @transform_5(%arg0: i32) -> (i32, i32) {
    %c0_i32 = arith.constant 0 : i32
    %c0_i32_0 = arith.constant 0 : i32
    return %arg0, %c0_i32 : i32, i32
  }
}

</mosaic_0001>

<bundles_post_ra>
// kernel: _forward_impl.1
= control target key start
LH: loop header
LB: loop body
LE: loop exit
PB: predicated region body
PF: predicated region fallthrough
CT: control target
= control target key end

     0   :  { %s623_s18 = smov 0   ;;  %s683_s0 = inlined_call_operand.vmem [shape: f32[64,32], index: 0, kind: input, shape index: {}]   ;;  %s684_s1 = inlined_call_operand.vmem [shape: bf16[32,128], index: 1, kind: input, shape index: {}]   ;;  %s685_s2 = inlined_call_operand.vmem [shape: f32[1,128], index: 2, kind: input, shape index: {}]   ;;  %s686_s3 = inlined_call_operand.vmem [shape: bf16[128,128], index: 3, kind: input, shape index: {}]   ;;  %s687_s4 = inlined_call_operand.vmem [shape: f32[1,128], index: 4, kind: input, shape index: {}]   ;;  %s688_s5 = inlined_call_operand.vmem [shape: f32[64,128], index: 5, kind: output, shape index: {}]  }
   0x1 LB: > { %s500_s19 = sadd.s32 4294967295, %s591_s18   ;;  %p504_p0 = scmp.ge.s32.totalorder %s591_s18, 1  ;;  %s591_s18 = sphi %s623_s18, %s15_s18  }
   0x2   : > { %p188_p1 = scmp.lt.s32.totalorder %s591_s18, 3 }
   0x4   : > { %p189_p2 = pnand %p504_p0, %p188_p1 }
   0x5   : > { %v575_v0 = vld [vmem:[%s684_s1] sm:$0xff] (!%p189_p2)   ;;  %s505_s22 = sshll.u32 (!%p189_p2), %s500_s19, 2  ;;  %v576_v1 = vld [vmem:[%s684_s1 + $0x8] sm:$0xff] (!%p189_p2)   ;;  %v579_v4 = vld [vmem:[%s686_s3 + $0x10] sm:$0xff] (!%p189_p2)   ;;  %vm258_vm0 = vcmask (!%p189_p2), 261120  }
   0x6   : > { %192 = sbr.rel (%p189_p2) target bundleno = 460 (0x1cc), region = 40  ;;  %p217_p3 = scmp.lt.s32.totalorder (!%p189_p2), %s505_s22, 7  ;;  %539 = vmatprep.subr.bf16.mxu0 (!%p189_p2), %v575_v0  ;;  %v577_v2 = vld [vmem:[%s686_s3] sm:$0xff] (!%p189_p2)   ;;  %v578_v3 = vld [vmem:[%s686_s3 + $0x8] sm:$0xff] (!%p189_p2)   ;;  %v580_v11 = vld [vmem:[%s686_s3 + $0x18] sm:$0xff] (!%p189_p2)  }
   0x7   : > { %540 = vmatpush3.bf16.msra.mxu0 (!%p189_p2), %v575_v0  ;;  %547 = vmatprep.subr.bf16.mxu1 (!%p189_p2), %v577_v2  ;;  %v581_v12 = vld [vmem:[%s686_s3 + $0x20] sm:$0xff] (!%p189_p2)   ;;  %v582_v13 = vld [vmem:[%s686_s3 + $0x28] sm:$0xff] (!%p189_p2)   ;;  %v583_v14 = vld [vmem:[%s686_s3 + $0x30] sm:$0xff] (!%p189_p2)  }
   0x8   : > { %541 = vmatprep.subr.bf16.mxu0 (!%p189_p2), %v576_v1  ;;  %548 = vmatpush3.bf16.msra.mxu1 (!%p189_p2), %v577_v2  ;;  %v584_v15 = vld [vmem:[%s686_s3 + $0x38] sm:$0xff] (!%p189_p2)   ;;  %v509_v16 = vld [vmem:[%s685_s2] ss:$0 sm:$0xff] (!%p189_p2) }
   0x9   : > { %549 = vmatprep.subr.bf16.mxu1 (!%p189_p2), %v578_v3  ;;  %v514_v31 = vld [vmem:[%s687_s4] ss:$0 sm:$0xff] (!%p189_p2) }
   0xb   : > { %542 = vmatpush3.bf16.msra.mxu0 (!%p189_p2), %v576_v1 }
   0xc   : > { %550 = vmatpush3.bf16.msra.mxu1 (!%p189_p2), %v578_v3 }
   0xd   : > { %s690_s22 = smov (!%p217_p3, %s505_s22), 7  ;;  %551 = vmatprep.subr.bf16.mxu1 %v579_v4 }
   0xe   : > { %s506_s29 = sshll.u32 %s690_s22, 3 }
   0xf   : > { %s220_s7 = scalar_lea.vmem %s683_s0, %s506_s29  ;;  %s226_s28 = scalar_lea.vmem %s688_s5, %s506_s29 }
  0x10   : > { %v229_v5 = vld [vmem:[%s220_s7] sm:$0xff]  ;;  %v230_v6 = vld [vmem:[%s220_s7 + $0x8] sm:$0xff]  ;;  %v231_v7 = vld [vmem:[%s220_s7 + $0x10] sm:$0xff]  ;;  %552 = vmatpush3.bf16.msra.mxu1 %v579_v4 }
  0x11   : > { %v233_v8 = vpack.c.bf16 %v230_v6, %v229_v5  ;;  %v232_v9 = vld [vmem:[%s220_s7 + $0x18] sm:$0xff]  ;;  %553 = vmatprep.subr.bf16.mxu1 %v580_v11 }
  0x12   : > { %v234_v10 = vpack.c.bf16 %v232_v9, %v231_v7 }
  0x13   : > { %543 = vmatprep.mubr.msk.bf16.mxu0 %vm258_vm0, %v233_v8 }
  0x14   : > { %544 = vmatmul.mubr.msk.bf16.vlgmr.msra.gmra.mrb[0].mxu0 %vm258_vm0, %v234_v10  ;;  %554 = vmatpush3.bf16.msra.mxu1 %v580_v11 }
  0x15   : > { %555 = vmatprep.subr.bf16.mxu1 %v581_v12 }
  0x18   : > { %556 = vmatpush3.bf16.msra.mxu1 %v581_v12 }
  0x19   : > { %557 = vmatprep.subr.bf16.mxu1 %v582_v13 }
  0x1c   : > { %558 = vmatpush3.bf16.msra.mxu1 %v582_v13 }
  0x1d   : > { %559 = vmatprep.subr.bf16.mxu1 %v583_v14 }
  0x20   : > { %560 = vmatpush3.bf16.msra.mxu1 %v583_v14 }
  0x21   : > { %561 = vmatprep.subr.bf16.mxu1 %v584_v15 }
  0x24   : > { %562 = vmatpush3.bf16.msra.mxu1 %v584_v15 }
  0xe7   : > { %v545_v17 = vpop.f32.mrb[0].mxu0 }
  0xe8   : > { %v308_v18 = vadd.f32 %v545_v17, %v509_v16  ;;  %v299_v19 = vpop.f32.mrb[1].mxu0 }
  0xe9   : > { %v300_v20 = vadd.f32 %v509_v16, %v299_v19  ;;  %v546_v21 = vpop.f32.mrb[2].mxu0 }
  0xea   : > { %v311_v22 = vadd.f32 %v546_v21, %v509_v16  ;;  %v302_v23 = vpop.f32.mrb[3].mxu0  ;;  %v316_v25 = vmax.f32 %v308_v18, 0.0 }
  0xeb   : > { %v303_v24 = vadd.f32 %v509_v16, %v302_v23  ;;  %v314_v27 = vmax.f32 %v300_v20, 0.0 }
  0xec   : > { %v317_v26 = vmax.f32 %v311_v22, 0.0 }
  0xed   : > { %v315_v28 = vmax.f32 %v303_v24, 0.0 }
  0xee   : > { %v319_v29 = vpack.c.bf16 %v317_v26, %v316_v25 }
  0xef   : > { %v318_v30 = vpack.c.bf16 %v315_v28, %v314_v27 }
  0xf1   : > { %563 = vmatprep.mubr.bf16.mxu1 %v318_v30 }
  0xf2   : > { %564 = vmatmul.mubr.bf16.vlgmr.msra.gmra.mrb[0].mxu1 %v319_v29 }
 0x1c5   : > { %v565_v32 = vpop.f32.mrb[0].mxu1 }
 0x1c6   : > { %v425_v33 = vpop.f32.mrb[1].mxu1  ;;  %v434_v38 = vadd.f32 %v565_v32, %v514_v31 }
 0x1c7   : > { %v426_v34 = vadd.f32 %v514_v31, %v425_v33  ;;  %v566_v35 = vpop.f32.mrb[2].mxu1 }
 0x1c8   : > { %v428_v36 = vpop.f32.mrb[3].mxu1  ;;  %v437_v39 = vadd.f32 %v566_v35, %v514_v31  ;;  %442 = vst [vmem:[%s226_s28 + $0x10] sm:$0xff] %v434_v38 }
 0x1c9   : > { %440 = vst [vmem:[%s226_s28] sm:$0xff] %v426_v34  ;;  %v429_v37 = vadd.f32 %v514_v31, %v428_v36 }
 0x1ca   : > { %443 = vst [vmem:[%s226_s28 + $0x18] sm:$0xff] %v437_v39 }
 0x1cb   : > { %441 = vst [vmem:[%s226_s28 + $0x8] sm:$0xff] %v429_v37 }
 0x1cc PF: > { %s15_s18 = sadd.s32 1, %s591_s18  }
 0x1cd   : > { %p12_p4 = scmp.ge.s32.totalorder %s15_s18, 4  }
 0x1cf   :  { %14 = sbr.rel (!%p12_p4) target bundleno = 1 (0x1), region = 70 }

// kernel: _forward_impl.1
= control target key start
LH: loop header
LB: loop body
LE: loop exit
PB: predicated region body
PF: predicated region fallthrough
CT: control target
= control target key end

     0   :  { %s623_s18 = smov 0   ;;  %s683_s0 = inlined_call_operand.vmem [shape: f32[64,32], index: 0, kind: input, shape index: {}]   ;;  %s684_s1 = inlined_call_operand.vmem [shape: bf16[32,128], index: 1, kind: input, shape index: {}]   ;;  %s685_s2 = inlined_call_operand.vmem [shape: f32[1,128], index: 2, kind: input, shape index: {}]   ;;  %s686_s3 = inlined_call_operand.vmem [shape: bf16[128,128], index: 3, kind: input, shape index: {}]   ;;  %s687_s4 = inlined_call_operand.vmem [shape: f32[1,128], index: 4, kind: input, shape index: {}]   ;;  %s688_s5 = inlined_call_operand.vmem [shape: f32[64,128], index: 5, kind: output, shape index: {}]  }
   0x1 LB: > { %s500_s19 = sadd.s32 4294967295, %s591_s18   ;;  %p504_p0 = scmp.ge.s32.totalorder %s591_s18, 1  ;;  %s591_s18 = sphi %s623_s18, %s15_s18  }
   0x2   : > { %p188_p1 = scmp.lt.s32.totalorder %s591_s18, 3 }
   0x4   : > { %p189_p2 = pnand %p504_p0, %p188_p1 }
   0x5   : > { %v575_v0 = vld [vmem:[%s684_s1] sm:$0xff] (!%p189_p2)   ;;  %s505_s22 = sshll.u32 (!%p189_p2), %s500_s19, 2  ;;  %v576_v1 = vld [vmem:[%s684_s1 + $0x8] sm:$0xff] (!%p189_p2)   ;;  %v579_v4 = vld [vmem:[%s686_s3 + $0x10] sm:$0xff] (!%p189_p2)   ;;  %vm258_vm0 = vcmask (!%p189_p2), 261120  }
   0x6   : > { %192 = sbr.rel (%p189_p2) target bundleno = 460 (0x1cc), region = 40  ;;  %p217_p3 = scmp.lt.s32.totalorder (!%p189_p2), %s505_s22, 7  ;;  %539 = vmatprep.subr.bf16.mxu0 (!%p189_p2), %v575_v0  ;;  %v577_v2 = vld [vmem:[%s686_s3] sm:$0xff] (!%p189_p2)   ;;  %v578_v3 = vld [vmem:[%s686_s3 + $0x8] sm:$0xff] (!%p189_p2)   ;;  %v580_v11 = vld [vmem:[%s686_s3 + $0x18] sm:$0xff] (!%p189_p2)  }
   0x7   : > { %540 = vmatpush3.bf16.msra.mxu0 (!%p189_p2), %v575_v0  ;;  %547 = vmatprep.subr.bf16.mxu1 (!%p189_p2), %v577_v2  ;;  %v581_v12 = vld [vmem:[%s686_s3 + $0x20] sm:$0xff] (!%p189_p2)   ;;  %v582_v13 = vld [vmem:[%s686_s3 + $0x28] sm:$0xff] (!%p189_p2)   ;;  %v583_v14 = vld [vmem:[%s686_s3 + $0x30] sm:$0xff] (!%p189_p2)  }
   0x8   : > { %541 = vmatprep.subr.bf16.mxu0 (!%p189_p2), %v576_v1  ;;  %548 = vmatpush3.bf16.msra.mxu1 (!%p189_p2), %v577_v2  ;;  %v584_v15 = vld [vmem:[%s686_s3 + $0x38] sm:$0xff] (!%p189_p2)   ;;  %v509_v16 = vld [vmem:[%s685_s2] ss:$0 sm:$0xff] (!%p189_p2) }
   0x9   : > { %549 = vmatprep.subr.bf16.mxu1 (!%p189_p2), %v578_v3  ;;  %v514_v31 = vld [vmem:[%s687_s4] ss:$0 sm:$0xff] (!%p189_p2) }
   0xb   : > { %542 = vmatpush3.bf16.msra.mxu0 (!%p189_p2), %v576_v1 }
   0xc   : > { %550 = vmatpush3.bf16.msra.mxu1 (!%p189_p2), %v578_v3 }
   0xd   : > { %s690_s22 = smov (!%p217_p3, %s505_s22), 7  ;;  %551 = vmatprep.subr.bf16.mxu1 %v579_v4 }
   0xe   : > { %s506_s29 = sshll.u32 %s690_s22, 3 }
   0xf   : > { %s220_s7 = scalar_lea.vmem %s683_s0, %s506_s29  ;;  %s226_s28 = scalar_lea.vmem %s688_s5, %s506_s29 }
  0x10   : > { %v229_v5 = vld [vmem:[%s220_s7] sm:$0xff]  ;;  %v230_v6 = vld [vmem:[%s220_s7 + $0x8] sm:$0xff]  ;;  %v231_v7 = vld [vmem:[%s220_s7 + $0x10] sm:$0xff]  ;;  %552 = vmatpush3.bf16.msra.mxu1 %v579_v4 }
  0x11   : > { %v233_v8 = vpack.c.bf16 %v230_v6, %v229_v5  ;;  %v232_v9 = vld [vmem:[%s220_s7 + $0x18] sm:$0xff]  ;;  %553 = vmatprep.subr.bf16.mxu1 %v580_v11 }
  0x12   : > { %v234_v10 = vpack.c.bf16 %v232_v9, %v231_v7 }
  0x13   : > { %543 = vmatprep.mubr.msk.bf16.mxu0 %vm258_vm0, %v233_v8 }
  0x14   : > { %544 = vmatmul.mubr.msk.bf16.vlgmr.msra.gmra.mrb[0].mxu0 %vm258_vm0, %v234_v10  ;;  %554 = vmatpush3.bf16.msra.mxu1 %v580_v11 }
  0x15   : > { %555 = vmatprep.subr.bf16.mxu1 %v581_v12 }
  0x18   : > { %556 = vmatpush3.bf16.msra.mxu1 %v581_v12 }
  0x19   : > { %557 = vmatprep.subr.bf16.mxu1 %v582_v13 }
  0x1c   : > { %558 = vmatpush3.bf16.msra.mxu1 %v582_v13 }
  0x1d   : > { %559 = vmatprep.subr.bf16.mxu1 %v583_v14 }
  0x20   : > { %560 = vmatpush3.bf16.msra.mxu1 %v583_v14 }
  0x21   : > { %561 = vmatprep.subr.bf16.mxu1 %v584_v15 }
  0x24   : > { %562 = vmatpush3.bf16.msra.mxu1 %v584_v15 }
  0xe7   : > { %v545_v17 = vpop.f32.mrb[0].mxu0 }
  0xe8   : > { %v308_v18 = vadd.f32 %v545_v17, %v509_v16  ;;  %v299_v19 = vpop.f32.mrb[1].mxu0 }
  0xe9   : > { %v300_v20 = vadd.f32 %v509_v16, %v299_v19  ;;  %v546_v21 = vpop.f32.mrb[2].mxu0 }
  0xea   : > { %v311_v22 = vadd.f32 %v546_v21, %v509_v16  ;;  %v302_v23 = vpop.f32.mrb[3].mxu0  ;;  %v316_v25 = vmax.f32 %v308_v18, 0.0 }
  0xeb   : > { %v303_v24 = vadd.f32 %v509_v16, %v302_v23  ;;  %v314_v27 = vmax.f32 %v300_v20, 0.0 }
  0xec   : > { %v317_v26 = vmax.f32 %v311_v22, 0.0 }
  0xed   : > { %v315_v28 = vmax.f32 %v303_v24, 0.0 }
  0xee   : > { %v319_v29 = vpack.c.bf16 %v317_v26, %v316_v25 }
  0xef   : > { %v318_v30 = vpack.c.bf16 %v315_v28, %v314_v27 }
  0xf1   : > { %563 = vmatprep.mubr.bf16.mxu1 %v318_v30 }
  0xf2   : > { %564 = vmatmul.mubr.bf16.vlgmr.msra.gmra.mrb[0].mxu1 %v319_v29 }
 0x1c5   : > { %v565_v32 = vpop.f32.mrb[0].mxu1 }
 0x1c6   : > { %v425_v33 = vpop.f32.mrb[1].mxu1  ;;  %v434_v38 = vadd.f32 %v565_v32, %v514_v31 }
 0x1c7   : > { %v426_v34 = vadd.f32 %v514_v31, %v425_v33  ;;  %v566_v35 = vpop.f32.mrb[2].mxu1 }
 0x1c8   : > { %v428_v36 = vpop.f32.mrb[3].mxu1  ;;  %v437_v39 = vadd.f32 %v566_v35, %v514_v31  ;;  %442 = vst [vmem:[%s226_s28 + $0x10] sm:$0xff] %v434_v38 }
 0x1c9   : > { %440 = vst [vmem:[%s226_s28] sm:$0xff] %v426_v34  ;;  %v429_v37 = vadd.f32 %v514_v31, %v428_v36 }
 0x1ca   : > { %443 = vst [vmem:[%s226_s28 + $0x18] sm:$0xff] %v437_v39 }
 0x1cb   : > { %441 = vst [vmem:[%s226_s28 + $0x8] sm:$0xff] %v429_v37 }
 0x1cc PF: > { %s15_s18 = sadd.s32 1, %s591_s18  }
 0x1cd   : > { %p12_p4 = scmp.ge.s32.totalorder %s15_s18, 4  }
 0x1cf   :  { %14 = sbr.rel (!%p12_p4) target bundleno = 1 (0x1), region = 70 }

</bundles_post_ra>
